<compile_context>
chip_gen: v7x
topology: tpu7x:2x2x1
jax: 0.10.0
libtpu: 0.0.40
codegen_flags: <defaults>
</compile_context>

<pallas_src>
import functools

import jax
import jax.numpy as jnp
import numpy as np
from jax.experimental import pallas as pl
from jax.experimental.pallas import tpu as pltpu

# ---- static configuration (small, consistent with the module) ---------------
HARMONICS = 2
BACKCAST_SIZE = 16
FORECAST_SIZE = 8
DEGREE_OF_POLYNOMIAL = 2   # unused by SeasonalityBasis (ctor arg only)
VARIATION = False          # unused by SeasonalityBasis (ctor arg only)
BATCH = 2
K_DIM = 4

_LANE = 128
_MAX_ROW_TILE = 2048           # rows per grid step once batch*K is large
COMPUTE_DTYPE = jnp.bfloat16   # bf16 inputs, f32 accumulation on the MXU


def _round_up(x, n):
    return (x + n - 1) // n * n


def make_seasonality_basis(harmonics, backcast_size, forecast_size):
    """Exact numpy port of the PyTorch constructor's basis construction."""
    frequency = np.append(
        np.zeros(1, dtype=np.float32),
        np.arange(harmonics, harmonics / 2 * (forecast_size + backcast_size),
                  dtype=np.float32) / harmonics)[None, :]
    total = backcast_size + forecast_size
    grid_t = np.arange(total, dtype=np.float32)[:, None] / total
    total_grid = -2 * np.pi * grid_t * frequency
    total_grid2 = -2 * np.pi * grid_t * frequency - -0.25 * np.pi * frequency
    backcast_grid = total_grid[:backcast_size, :]
    forecast_grid = total_grid[backcast_size:, :]
    backcast_grid2 = total_grid2[:backcast_size, :]
    forecast_grid2 = total_grid2[backcast_size:, :]
    backcast_basis = np.concatenate(
        [np.cos(backcast_grid).T, np.sin(backcast_grid).T,
         np.cos(backcast_grid2).T, np.sin(backcast_grid2).T], axis=0)
    forecast_basis = np.concatenate(
        [np.cos(forecast_grid).T, np.sin(forecast_grid).T,
         np.cos(forecast_grid2).T, np.sin(forecast_grid2).T], axis=0)
    return (backcast_basis.astype(np.float32),
            forecast_basis.astype(np.float32))


def prepare_basis(backcast_basis, forecast_basis, dtype=COMPUTE_DTYPE):
    """One-time prep: fuse both bases into one [P_pad, Tb+Tf] matrix.

    Columns are backcast||forecast (no lane padding, so no wasted output
    bytes); rows (contraction dim P) are zero-padded to a multiple of 128 so
    the theta DMA is lane-dense.  Zero-padding the contraction is exact.
    """
    combined = np.concatenate([backcast_basis, forecast_basis], axis=1)  # [P, Tb+Tf]
    p = combined.shape[0]
    p_pad = _round_up(p, _LANE)
    padded = np.zeros((p_pad, combined.shape[1]), dtype=np.float32)
    padded[:p, :] = combined
    return jnp.asarray(padded, dtype=dtype)


def prepare_theta(theta, p_pad, dtype=COMPUTE_DTYPE):
    """Producer-side one-time prep: compute dtype + zero-pad feature dim.

    In a real model the upstream projection emits theta already in bf16 with
    P_pad features, so neither the cast nor the pad appears per call.
    """
    p = theta.shape[-1]
    theta = theta.astype(dtype)
    if p != p_pad:
        theta = jnp.pad(theta, ((0, 0), (0, 0), (0, p_pad - p)))
    return theta


def seasonality_kernel(theta_ref, basis_ref, back_ref, fore_ref, *, backcast_size):
    # One fused MXU matmul over the concatenated basis; split on store.
    acc = jnp.dot(theta_ref[...], basis_ref[...],
                  preferred_element_type=jnp.float32)
    back_ref[...] = acc[:, :backcast_size].astype(back_ref.dtype)
    fore_ref[...] = acc[:, backcast_size:].astype(fore_ref.dtype)


@functools.partial(jax.jit, static_argnames=("backcast_size", "forecast_size"))
def seasonality_basis_forward(theta, basis, *, backcast_size, forecast_size):
    """theta: [B, K, P_pad] (bf16 or f32).  basis: [P_pad, Tb+Tf].

    Returns (backcast [B, K, Tb] f32, forecast [B, K, Tf] f32).
    """
    b, k, p_pad = theta.shape
    t_total = basis.shape[1]
    assert basis.shape[0] == p_pad
    assert t_total == backcast_size + forecast_size
    m = b * k
    theta_flat = theta.reshape(m, p_pad)       # contiguous merge: no copy

    # Row tiling: single full-dim block if it fits, else 2048-row tiles with a
    # Pallas-masked ragged last tile (no per-call padding copy of theta).
    if m <= _MAX_ROW_TILE:
        tm = m
    else:
        tm = _MAX_ROW_TILE
    grid = (pl.cdiv(m, tm),)

    itemsize = jnp.dtype(theta.dtype).itemsize
    cost = pl.CostEstimate(
        flops=2 * m * p_pad * t_total,
        transcendentals=0,
        bytes_accessed=(m * p_pad * itemsize          # theta read
                        + p_pad * t_total * itemsize  # basis read (resident)
                        + m * t_total * 4))           # f32 outputs

    kernel = functools.partial(seasonality_kernel, backcast_size=backcast_size)
    backcast, forecast = pl.pallas_call(
        kernel,
        out_shape=(jax.ShapeDtypeStruct((m, backcast_size), jnp.float32),
                   jax.ShapeDtypeStruct((m, forecast_size), jnp.float32)),
        grid_spec=pltpu.PrefetchScalarGridSpec(
            num_scalar_prefetch=0,
            grid=grid,
            in_specs=[
                pl.BlockSpec((tm, p_pad), lambda i: (i, 0)),       # theta rows
                pl.BlockSpec((p_pad, t_total), lambda i: (0, 0)),  # resident basis
            ],
            out_specs=[
                pl.BlockSpec((tm, backcast_size), lambda i: (i, 0)),
                pl.BlockSpec((tm, forecast_size), lambda i: (i, 0)),
            ],
        ),
        compiler_params=pltpu.CompilerParams(
            dimension_semantics=("parallel",)),   # megacore shard on v7x when grid > 1
        cost_estimate=cost,
    )(theta_flat, basis)

    return (backcast.reshape(b, k, backcast_size),
            forecast.reshape(b, k, forecast_size))


def reference(theta, backcast_basis, forecast_basis):
    """Plain-JAX f32 reference of the same forward."""
    bb = jnp.asarray(backcast_basis, jnp.float32)
    fb = jnp.asarray(forecast_basis, jnp.float32)
    th = theta.astype(jnp.float32)
    backcast = jnp.einsum('bkp,pt->bkt', th, bb)
    forecast = jnp.einsum('bkp,pt->bkt', th, fb)
    return backcast, forecast


if __name__ == "__main__":
    backcast_basis, forecast_basis = make_seasonality_basis(
        HARMONICS, BACKCAST_SIZE, FORECAST_SIZE)
    p = backcast_basis.shape[0]                 # theta feature dim = 4 * n_freq = 92
    basis = prepare_basis(backcast_basis, forecast_basis)   # [P_pad, Tb+Tf] bf16
    p_pad = basis.shape[0]

    key = jax.random.PRNGKey(0)
    theta_f32 = jax.random.normal(key, (BATCH, K_DIM, p), jnp.float32)
    theta = prepare_theta(theta_f32, p_pad)     # producer-side bf16 + P padding

    backcast, forecast = seasonality_basis_forward(
        theta, basis, backcast_size=BACKCAST_SIZE, forecast_size=FORECAST_SIZE)
    jax.block_until_ready((backcast, forecast))

    assert backcast.shape == (BATCH, K_DIM, BACKCAST_SIZE)
    assert forecast.shape == (BATCH, K_DIM, FORECAST_SIZE)

    # Tight check: same bf16-rounded inputs, f32 einsum reference.
    bb_q = np.asarray(basis[:p, :BACKCAST_SIZE].astype(jnp.float32))
    fb_q = np.asarray(basis[:p, BACKCAST_SIZE:].astype(jnp.float32))
    ref_b, ref_f = reference(theta[..., :p], bb_q, fb_q)
    assert jnp.allclose(backcast, ref_b, atol=1e-3, rtol=1e-3)
    assert jnp.allclose(forecast, ref_f, atol=1e-3, rtol=1e-3)

    # Loose sanity check vs the exact f32 module semantics (difference is only
    # the one-time bf16 rounding of theta / basis).
    ref_b32, ref_f32 = reference(theta_f32, backcast_basis, forecast_basis)
    assert jnp.allclose(backcast, ref_b32, atol=1e-1, rtol=1e-1)
    assert jnp.allclose(forecast, ref_f32, atol=1e-1, rtol=1e-1)
    print("KERNEL_OK")
</pallas_src>

<mosaic_0001>
module attributes {stable_mosaic.version = 11 : i64} {
  func.func @seasonality_kernel(%arg0: i32, %arg1: memref<8x128xbf16, #tpu.memory_space<vmem>>, %arg2: memref<128x24xbf16, #tpu.memory_space<vmem>>, %arg3: memref<8x16xf32, #tpu.memory_space<vmem>>, %arg4: memref<8x8xf32, #tpu.memory_space<vmem>>) attributes {dimension_semantics = [#tpu.dimension_semantics<parallel>], iteration_bounds = array<i64: 1>, scalar_prefetch = 0 : i64, scratch_operands = 0 : i64, tpu.core_type = #tpu.core_type<tc>, window_params = [{transform_indices = @transform_0, window_bounds = array<i64: 8, 128>}, {pipeline_mode = #tpu.pipeline_mode<synchronous>, transform_indices = @transform_1, window_bounds = array<i64: 128, 24>}, {transform_indices = @transform_2, window_bounds = array<i64: 8, 16>}, {transform_indices = @transform_3, window_bounds = array<i64: 8, 8>}]} {
    %c0 = arith.constant 0 : index
    %c0_0 = arith.constant 0 : index
    %0 = vector.load %arg1[%c0, %c0_0] : memref<8x128xbf16, #tpu.memory_space<vmem>>, vector<8x128xbf16>
    %c0_1 = arith.constant 0 : index
    %c0_2 = arith.constant 0 : index
    %1 = vector.load %arg2[%c0_1, %c0_2] : memref<128x24xbf16, #tpu.memory_space<vmem>>, vector<128x24xbf16>
    %cst = arith.constant dense<0.000000e+00> : vector<8x24xf32>
    %2 = tpu.matmul %0, %1, %cst {dimension_numbers = #tpu.dot_dimension_numbers<[1], [0], [0], [1], [0, 0, 1, 1], [], []>} : vector<8x128xbf16>, vector<128x24xbf16>, vector<8x24xf32> -> vector<8x24xf32>
    %3 = vector.extract_strided_slice %2 {offsets = [0, 0], sizes = [8, 16], strides = [1, 1]} : vector<8x24xf32> to vector<8x16xf32>
    %c0_3 = arith.constant 0 : index
    %c0_4 = arith.constant 0 : index
    %4 = vector.load %arg3[%c0_3, %c0_4] : memref<8x16xf32, #tpu.memory_space<vmem>>, vector<8x16xf32>
    tpu.vector_store %arg3[%c0_3, %c0_4], %3 {strides = array<i32>} : memref<8x16xf32, #tpu.memory_space<vmem>>, vector<8x16xf32>,
    %5 = vector.extract_strided_slice %2 {offsets = [0, 16], sizes = [8, 8], strides = [1, 1]} : vector<8x24xf32> to vector<8x8xf32>
    %c0_5 = arith.constant 0 : index
    %c0_6 = arith.constant 0 : index
    %6 = vector.load %arg4[%c0_5, %c0_6] : memref<8x8xf32, #tpu.memory_space<vmem>>, vector<8x8xf32>
    tpu.vector_store %arg4[%c0_5, %c0_6], %5 {strides = array<i32>} : memref<8x8xf32, #tpu.memory_space<vmem>>, vector<8x8xf32>,
    return
  }
  func.func @transform_0(%arg0: i32) -> (i32, i32) {
    %c0_i32 = arith.constant 0 : i32
    %c0_i32_0 = arith.constant 0 : i32
    return %arg0, %c0_i32 : i32, i32
  }
  func.func @transform_1(%arg0: i32) -> (i32, i32) {
    %c0_i32 = arith.constant 0 : i32
    %c0_i32_0 = arith.constant 0 : i32
    %c0_i32_1 = arith.constant 0 : i32
    return %c0_i32, %c0_i32_0 : i32, i32
  }
  func.func @transform_2(%arg0: i32) -> (i32, i32) {
    %c0_i32 = arith.constant 0 : i32
    %c0_i32_0 = arith.constant 0 : i32
    return %arg0, %c0_i32 : i32, i32
  }
  func.func @transform_3(%arg0: i32) -> (i32, i32) {
    %c0_i32 = arith.constant 0 : i32
    %c0_i32_0 = arith.constant 0 : i32
    return %arg0, %c0_i32 : i32, i32
  }
}

</mosaic_0001>

<bundles_post_ra>
// kernel: seasonality_basis_forward.1
= control target key start
LH: loop header
LB: loop body
LE: loop exit
PB: predicated region body
PF: predicated region fallthrough
CT: control target
= control target key end

     0   :  { %9 = vsyncpa [#allocation3], 0  ;;  %v255_v1 = vmov 0.0   ;;  %vm256_vm0 = vmmov 0   ;;  %s331_s0 = inlined_call_operand.vmem [shape: bf16[8,128], index: 0, kind: input, shape index: {}]   ;;  %s332_s1 = inlined_call_operand.vmem [shape: bf16[128,24], index: 1, kind: input, shape index: {}]   ;;  %s333_s2 = inlined_call_operand.hbm [shape: f32[8,16], index: 2, kind: output, shape index: {0}]   ;;  %s334_s3 = inlined_call_operand.hbm [shape: f32[8,8], index: 3, kind: output, shape index: {1}]  }
   0x1   :  { %v199_v0 = vld [vmem:[%s332_s1] sm:$0xff]   ;;  %174 = vmatprep.subr.bf16.mxu0 %v255_v1  ;;  %v200_v2 = vld [vmem:[%s332_s1 + $0x8] sm:$0xff]   ;;  %190 = vmatprep.mubr.msk.bf16.mxu0 %vm256_vm0, %v255_v1  ;;  %v201_v3 = vld [vmem:[%s332_s1 + $0x10] sm:$0xff]  }
   0x2   :  { %175 = vmatpush3.bf16.msra.mxu0 %v199_v0 }
   0x3   :  { %176 = vmatprep.subr.bf16.mxu0 %v255_v1 }
   0x6   :  { %177 = vmatpush3.bf16.msra.mxu0 %v200_v2 }
   0x7   :  { %178 = vmatprep.subr.bf16.mxu0 %v255_v1 }
   0x8   :  { %10 = vsyncpa [#allocation5], 0  ;;  %v202_v4 = vld [vmem:[%s332_s1 + $0x18] sm:$0xff]   ;;  %v203_v5 = vld [vmem:[%s332_s1 + $0x20] sm:$0xff]   ;;  %s257_s30 = smov [#allocation2]   ;;  %vm121_vm1 = vcmask 130048  }
   0x9   :  { %v204_v6 = vld [vmem:[%s332_s1 + $0x28] sm:$0xff]   ;;  %v205_v7 = vld [vmem:[%s332_s1 + $0x30] sm:$0xff]   ;;  %v206_v8 = vld [vmem:[%s332_s1 + $0x38] sm:$0xff]   ;;  %s135_s4 = sshll.u32 %s257_s30, 4  ;;  %s258_s5 = smov 112   ;;  %s136_s4 = int_to_ptr.vmem [resolvable:$true] %s135_s4 }
   0xa   :  { %179 = vmatpush3.bf16.msra.mxu0 %v201_v3  ;;  %v16_v9 = vld [vmem:[%s331_s0] sm:$0xf]  ;;  %s207_s6 = scalar_lea.vmem %s136_s4, 128  ;;  %p212_p1 = scmp.lt.s32.totalorder %s136_s4, %s136_s4 }
   0xb   :  { %180 = vmatprep.subr.bf16.mxu0 %v255_v1  ;;  %p208_p0 = scmp.ne.s32.totalorder %s136_s4, %s207_s6  ;;  %p213_p2 = scmp.lt.s32.totalorder %s207_s6, %s207_s6 }
   0xd   :  { %p214_p3 = por %p213_p2, %p212_p1 }
   0xe   :  { %181 = vmatpush3.bf16.msra.mxu0 %v202_v4 }
   0xf   :  { %182 = vmatprep.subr.bf16.mxu0 %v255_v1  ;;  %p215_p4 = pnand %p214_p3, %p208_p0 }
  0x12   :  { %183 = vmatpush3.bf16.msra.mxu0 %v203_v5 }
  0x13   :  { %184 = vmatprep.subr.bf16.mxu0 %v255_v1 }
  0x16   :  { %185 = vmatpush3.bf16.msra.mxu0 %v204_v6 }
  0x17   :  { %186 = vmatprep.subr.bf16.mxu0 %v255_v1 }
  0x1a   :  { %187 = vmatpush3.bf16.msra.mxu0 %v205_v7 }
  0x1b   :  { %188 = vmatprep.subr.bf16.mxu0 %v255_v1 }
  0x1e   :  { %189 = vmatpush3.bf16.msra.mxu0 %v206_v8 }
  0x21   :  { %191 = vmatmul.mubr.bf16.vlgmr.msra.gmra.mrb[0].mxu0 %v16_v9 }
  0xf4   :  { %v115_v10 = vpop.f32.mrb[0].mxu0 }
  0xf5   :  { %v192_v11 = vpop.f32.mrb[1].mxu0  ;;  %124 = vrot.lane.b32.xlu0 %v115_v10, %s258_s5  ;;  %122 = vst.msk [vmem:[#allocation2] sm:$0xff] %vm121_vm1, %v115_v10 }
  0xf6   :  { %v118_v12 = vpop.f32.mrb[2].mxu0 }
  0xf7   :  { %218 = shalt.err (!%p215_p4)
}
  0xf8   :  { %s219_s7 = scalar_lea.hbm %s333_s2, 128 }
  0xf9   :  { %p220_p5 = scmp.ne.s32.totalorder %s333_s2, %s219_s7  ;;  %p223_p6 = scmp.lt.u32.totalorder %s219_s7, %s333_s2 }
  0xfb   :  { %p225_p7 = pnand %p223_p6, %p220_p5 }
  0xfd   :  { %228 = shalt.err (!%p225_p7)
}
  0xfe   :  { %138 = dma.vmem_to_hbm [thread:$0]  %s136_s4, 128, %s333_s2, [#allocation3]   ;;  %v193_v13 = vpop.f32.mrb[3].mxu0  ;;  %vm127_vm2 = vcmask 64512  }
  0xff   :  { %s259_s14 = smov [#allocation4]  }
 0x100   :  { %s145_s15 = sshll.u32 %s259_s14, 4  ;;  %s146_s15 = int_to_ptr.vmem [resolvable:$true] %s145_s15 }
 0x101   :  { %s229_s16 = scalar_lea.vmem %s146_s15, 128  ;;  %p234_p9 = scmp.lt.s32.totalorder %s146_s15, %s146_s15 }
 0x102   :  { %p230_p8 = scmp.ne.s32.totalorder %s146_s15, %s229_s16  ;;  %p235_p10 = scmp.lt.s32.totalorder %s229_s16, %s229_s16 }
 0x104   :  { %p236_p11 = por %p235_p10, %p234_p9 }
 0x106   :  { %p237_p12 = pnand %p236_p11, %p230_p8 }
 0x167   :  { %v125_v14 = vpop.permute.xlu0 %124 }
 0x168   :  { %128 = vst.msk [vmem:[#allocation4] sm:$0xff] %vm127_vm2, %v125_v14 }
 0x169   :  { %240 = shalt.err (!%p237_p12)
}
 0x16a   :  { %s241_s19 = scalar_lea.hbm %s334_s3, 128 }
 0x16b   :  { %p242_p13 = scmp.ne.s32.totalorder %s334_s3, %s241_s19  ;;  %p245_p0 = scmp.lt.u32.totalorder %s241_s19, %s334_s3 }
 0x16d   :  { %p247_p1 = pnand %p245_p0, %p242_p13 }
 0x16f   :  { %250 = shalt.err (!%p247_p1)
}
 0x170   :  { %148 = dma.vmem_to_hbm [thread:$0]  %s146_s15, 128, %s334_s3, [#allocation5]  }
 0x171   :  { %251 = dma.done.wait [#allocation3], 128  }
 0x172   :  { %252 = vsyncadd [#allocation3], 4294967168 }
 0x173   :  { %253 = dma.done.wait [#allocation5], 128  }
 0x174   :  { %254 = vsyncadd [#allocation5], 4294967168 }
 0x175   :  { %155 = vsyncpa [#allocation3], 1 }
 0x176   :  { %156 = vsyncpa [#allocation5], 1 }

</bundles_post_ra>
